<compile_context>
chip_gen: v7x
topology: tpu7x:2x2x1
jax: 0.10.0
libtpu: 0.0.40
codegen_flags: <defaults>
</compile_context>

<pallas_src>
import numpy as np
import jax
import jax.numpy as jnp
from jax.experimental import pallas as pl
from jax.experimental.pallas import tpu as pltpu


def _build_pe_flat(d_model: int, max_len: int = 5000) -> jnp.ndarray:
    """Sinusoidal positional-encoding buffer, exactly as in the PyTorch
    __init__, pre-flattened to (1, max_len * d_model) float32 so the forward
    path never has to slice / cast / reshape it per call."""
    position = np.arange(0, max_len, dtype=np.float32)[:, None]            # (L, 1)
    div_term = np.exp(np.arange(0, d_model, 2, dtype=np.float32)
                      * (-np.log(10000.0) / d_model))                      # (D/2,)
    pe = np.zeros((max_len, d_model), dtype=np.float32)
    pe[:, 0::2] = np.sin(position * div_term)
    pe[:, 1::2] = np.cos(position * div_term)
    return jnp.asarray(pe.reshape(1, max_len * d_model))


def _add_pe_kernel(x_ref, pe_ref, o_ref):
    # x_ref / o_ref: (Bb, L) sublane+lane-dense tiles; pe_ref: (1, L).
    # Sublane broadcast of pe over the Bb batch rows + lockstep VPU add.
    # TODO(synk): output stays in x.dtype (PyTorch would promote half x + f32
    # pe to f32); exact for the f32 demo.
    o_ref[...] = x_ref[...] + pe_ref[...].astype(x_ref.dtype)


def _round_up(x: int, m: int) -> int:
    return ((x + m - 1) // m) * m


def _choose_lane_tile(total_lanes: int, rows: int, itemsize: int,
                      target_block_bytes: int) -> int:
    """Lane-tile width: always a multiple of 128 (unmasked stores, legal for
    both the ragged x blocks and the whole-pe BlockSpec), capped by a per-block
    byte budget.  Never depends on divisors of S or D."""
    padded = _round_up(total_lanes, 128)
    cap = max(128, (target_block_bytes // max(1, rows * itemsize)) // 128 * 128)
    return int(min(cap, padded))


_SMALL_BYTES = 256 * 1024  # below this, let XLA fuse the add


def positional_encoding_forward(x: jnp.ndarray, pe_flat: jnp.ndarray, *,
                                use_pallas: bool | None = None,
                                target_block_bytes: int = 2 * 1024 * 1024
                                ) -> jnp.ndarray:
    """y = x + pe[None, :S, :].   x: (B, S, D);  pe_flat: (1, max_len*D)."""
    B, S, D = x.shape
    total_lanes = S * D
    if total_lanes > pe_flat.shape[-1]:
        raise ValueError(
            f"sequence length {S} (x {D}) exceeds positional-encoding buffer "
            f"of {pe_flat.shape[-1]} elements")

    itemsize = jnp.dtype(x.dtype).itemsize

    if use_pallas is None:
        use_pallas = (x.size * itemsize) >= _SMALL_BYTES

    if not use_pallas:
        # Tiny-shape path: launch overhead would dominate; let XLA fuse it.
        pe_slice = jax.lax.slice(pe_flat, (0, 0), (1, total_lanes))
        return x + pe_slice.reshape(1, S, D).astype(x.dtype)

    # --- Pallas path -------------------------------------------------------
    bb = min(B, 8)                                   # sublane-dense batch block
    L = _choose_lane_tile(total_lanes, bb, itemsize, target_block_bytes)
    n_s = pl.cdiv(total_lanes, L)                    # lane-tile steps (outer)
    n_b = pl.cdiv(B, bb)                             # batch steps    (inner)

    x2 = x.reshape(B, total_lanes)                   # contiguous -> free reshape

    out2 = pl.pallas_call(
        _add_pe_kernel,
        out_shape=jax.ShapeDtypeStruct((B, total_lanes), x.dtype),
        grid_spec=pltpu.PrefetchScalarGridSpec(
            num_scalar_prefetch=0,
            grid=(n_s, n_b),
            in_specs=[
                # x tile: (Bb, L), ragged last blocks handled by Pallas.
                pl.BlockSpec((bb, L), lambda s, b: (b, s)),
                # pe tile: (1, L); block index varies only on the OUTER axis,
                # so it stays resident in VMEM across the inner batch loop.
                pl.BlockSpec((1, L), lambda s, b: (0, s)),
            ],
            out_specs=pl.BlockSpec((bb, L), lambda s, b: (b, s)),
        ),
        compiler_params=pltpu.CompilerParams(
            dimension_semantics=("parallel", "parallel"),
            # ~2 MiB x/out blocks + small pe block, double-buffered ~= 10 MiB:
            # fits every generation (v5e default 16 MiB is raised explicitly,
            # v7x 64 MiB physical has ample headroom).
            vmem_limit_bytes=32 * 1024 * 1024,
        ),
        cost_estimate=pl.CostEstimate(
            flops=B * total_lanes,
            transcendentals=0,
            bytes_accessed=(2 * B * total_lanes + total_lanes) * itemsize,
        ),
    )(x2, pe_flat)

    return out2.reshape(B, S, D)


if __name__ == "__main__":
    MAX_LEN = 5000

    # Small demo shape matching the module (batch=2, seq=8, d_model=32).
    B, S, D = 2, 8, 32
    key = jax.random.PRNGKey(0)
    x = jax.random.normal(key, (B, S, D), dtype=jnp.float32)
    pe_flat = _build_pe_flat(D, MAX_LEN)

    # Force the Pallas path so the kernel itself is exercised at the demo size.
    y = positional_encoding_forward(x, pe_flat, use_pallas=True)
    y = jax.block_until_ready(y)
    y_ref = x + pe_flat[0, :S * D].reshape(1, S, D)
    assert y.shape == (B, S, D)
    assert jnp.allclose(y, y_ref, atol=1e-6), "mismatch vs reference (small)"

    # Larger shape: exercises multi-tile lane grid + ragged batch block and
    # takes the default (auto -> Pallas) path.
    B2, S2, D2 = 9, 2048, 64
    xl = jax.random.normal(jax.random.PRNGKey(1), (B2, S2, D2), dtype=jnp.float32)
    pe_flat2 = _build_pe_flat(D2, MAX_LEN)
    yl = positional_encoding_forward(xl, pe_flat2)
    yl = jax.block_until_ready(yl)
    yl_ref = xl + pe_flat2[0, :S2 * D2].reshape(1, S2, D2)
    assert jnp.allclose(yl, yl_ref, atol=1e-6), "mismatch vs reference (large)"

    print("KERNEL_OK")
</pallas_src>

<mosaic_0001>
module attributes {stable_mosaic.version = 11 : i64} {
  func.func @_add_pe_kernel(%arg0: i32, %arg1: i32, %arg2: memref<2x256xf32, #tpu.memory_space<vmem>>, %arg3: memref<1x256xf32, #tpu.memory_space<vmem>>, %arg4: memref<2x256xf32, #tpu.memory_space<vmem>>) attributes {dimension_semantics = [#tpu.dimension_semantics<parallel>, #tpu.dimension_semantics<parallel>], iteration_bounds = array<i64: 1, 1>, scalar_prefetch = 0 : i64, scratch_operands = 0 : i64, tpu.core_type = #tpu.core_type<tc>, window_params = [{transform_indices = @transform_0, window_bounds = array<i64: 2, 256>}, {transform_indices = @transform_1, window_bounds = array<i64: 1, 256>}, {transform_indices = @transform_2, window_bounds = array<i64: 2, 256>}]} {
    %c0 = arith.constant 0 : index
    %c0_0 = arith.constant 0 : index
    %0 = vector.load %arg2[%c0, %c0_0] : memref<2x256xf32, #tpu.memory_space<vmem>>, vector<2x256xf32>
    %c0_1 = arith.constant 0 : index
    %c0_2 = arith.constant 0 : index
    %1 = vector.load %arg3[%c0_1, %c0_2] : memref<1x256xf32, #tpu.memory_space<vmem>>, vector<1x256xf32>
    %2 = vector.broadcast %1 : vector<1x256xf32> to vector<2x256xf32>
    %3 = arith.addf %0, %2 : vector<2x256xf32>
    %c0_3 = arith.constant 0 : index
    %c0_4 = arith.constant 0 : index
    %4 = vector.load %arg4[%c0_3, %c0_4] : memref<2x256xf32, #tpu.memory_space<vmem>>, vector<2x256xf32>
    tpu.vector_store %arg4[%c0_3, %c0_4], %3 {strides = array<i32>} : memref<2x256xf32, #tpu.memory_space<vmem>>, vector<2x256xf32>,
    return
  }
  func.func @transform_0(%arg0: i32, %arg1: i32) -> (i32, i32) {
    %c0_i32 = arith.constant 0 : i32
    return %arg1, %arg0 : i32, i32
  }
  func.func @transform_1(%arg0: i32, %arg1: i32) -> (i32, i32) {
    %c0_i32 = arith.constant 0 : i32
    %c0_i32_0 = arith.constant 0 : i32
    return %c0_i32, %arg0 : i32, i32
  }
  func.func @transform_2(%arg0: i32, %arg1: i32) -> (i32, i32) {
    %c0_i32 = arith.constant 0 : i32
    return %arg1, %arg0 : i32, i32
  }
}

</mosaic_0001>

<bundles_post_ra>
// kernel: tpu_custom_call.1
= control target key start
LH: loop header
LB: loop body
LE: loop exit
PB: predicated region body
PF: predicated region fallthrough
CT: control target
= control target key end

     0   :  { %7 = vsyncpa [#allocation3], 0  ;;  %s215_s0 = inlined_call_operand.hbm [shape: f32[2,256], index: 0, kind: input, shape index: {}]   ;;  %s216_s1 = inlined_call_operand.hbm [shape: f32[1,160000], index: 1, kind: input, shape index: {}]   ;;  %s217_s2 = inlined_call_operand.hbm [shape: f32[2,256], index: 2, kind: output, shape index: {}]  }
   0x1   :  { %8 = vsyncpa [#allocation6], 0 }
   0x2   :  { %9 = vsyncpa [#allocation4], 0  ;;  %s150_s9 = smov [#allocation2]   ;;  %s151_s11 = smov [#allocation5]  }
   0x3   :  { %s16_s10 = sshll.u32 %s150_s9, 4  ;;  %s26_s12 = sshll.u32 %s151_s11, 4  ;;  %s17_s10 = int_to_ptr.vmem [resolvable:$true] %s16_s10  ;;  %s169_s12 = int_to_ptr.vmem [resolvable:$true] %s26_s12 }
   0x4   :  { %s78_s15 = scalar_lea.hbm %s215_s0, 64 }
   0x5   :  { %p79_p0 = scmp.ne.s32.totalorder %s215_s0, %s78_s15  ;;  %p82_p1 = scmp.lt.u32.totalorder %s78_s15, %s215_s0 }
   0x7   :  { %p84_p2 = pnand %p82_p1, %p79_p0 }
   0x9   :  { %87 = shalt.err (!%p84_p2)
}
   0xa   :  { %s88_s20 = scalar_lea.vmem %s17_s10, 64  ;;  %p93_p4 = scmp.lt.s32.totalorder %s17_s10, %s17_s10 }
   0xb   :  { %p89_p3 = scmp.ne.s32.totalorder %s17_s10, %s88_s20  ;;  %p94_p5 = scmp.lt.s32.totalorder %s88_s20, %s88_s20 }
   0xd   :  { %p95_p6 = por %p94_p5, %p93_p4 }
   0xf   :  { %p96_p7 = pnand %p95_p6, %p89_p3 }
  0x11   :  { %99 = shalt.err (!%p96_p7)
}
  0x12   :  { %19 = dma.hbm_to_vmem [thread:$0]  %s215_s0, 64, %s17_s10, [#allocation3]  }
  0x13   :  { %s100_s25 = scalar_lea.hbm %s216_s1, 32  ;;  %s102_s30 = scalar_lea.hbm %s216_s1, 20000 }
  0x14   :  { %p101_p8 = scmp.ne.s32.totalorder %s216_s1, %s100_s25  ;;  %p103_p9 = scmp.lt.u32.totalorder %s102_s30, %s100_s25 }
  0x15   :  { %p104_p10 = scmp.lt.u32.totalorder %s100_s25, %s216_s1 }
  0x17   :  { %p105_p11 = por %p104_p10, %p103_p9 }
  0x19   :  { %p106_p12 = pnand %p105_p11, %p101_p8 }
  0x1b   :  { %109 = shalt.err (!%p106_p12)
}
  0x1c   :  { %s110_s0 = scalar_lea.vmem %s169_s12, 32  ;;  %p115_p0 = scmp.lt.s32.totalorder %s169_s12, %s169_s12 }
  0x1d   :  { %p111_p13 = scmp.ne.s32.totalorder %s169_s12, %s110_s0  ;;  %p116_p1 = scmp.lt.s32.totalorder %s110_s0, %s110_s0 }
  0x1f   :  { %p117_p2 = por %p116_p1, %p115_p0 }
  0x21   :  { %p118_p3 = pnand %p117_p2, %p111_p13 }
  0x23   :  { %121 = shalt.err (!%p118_p3)
}
  0x24   :  { %29 = dma.hbm_to_vmem [thread:$0]  %s216_s1, 32, %s169_s12, [#allocation6]  }
  0x25   :  { %144 = dma.done.wait [#allocation3], 64  }
  0x26   :  { %145 = vsyncadd [#allocation3], 4294967232 }
  0x27   :  { %146 = dma.done.wait [#allocation6], 32  }
  0x28   :  { %147 = vsyncadd [#allocation6], 4294967264  ;;  %v39_v0 = vlaneseq  ;;  %v152_v1 = vmov 1983009808   ;;  %v37_v7 = vld [vmem:[#allocation5] sm:$0x3] }
  0x29   :  { %v49_v2 = vunpack.c.l.s4 %v152_v1  ;;  %v36_v12 = vld [vmem:[#allocation2] sm:$0xf]  ;;  %s153_s7 = smov [#allocation7]  }
  0x2a   :  { %v40_v3 = vshrl.u32 %v39_v0, 7  ;;  %s64_s8 = sshll.u32 %s153_s7, 4  ;;  %s65_s8 = int_to_ptr.vmem [resolvable:$true] %s64_s8 }
  0x2b   :  { %v50_v6 = vunpack.c.0.s8 %v49_v2  ;;  %s122_s1 = scalar_lea.vmem %s65_s8, 64  ;;  %p127_p5 = scmp.lt.s32.totalorder %s65_s8, %s65_s8 }
  0x2c   :  { %v41_v4 = vsub.s32 0, %v40_v3  ;;  %v45_v5 = vsub.s32 1, %v40_v3  ;;  %p123_p4 = scmp.ne.s32.totalorder %s65_s8, %s122_s1  ;;  %p128_p6 = scmp.lt.s32.totalorder %s122_s1, %s122_s1 }
  0x2d   :  { %v53_v10 = vsub.s32 %v50_v6, %v40_v3 }
  0x2e   :  { %v42_v8 = vrot.slane %v37_v7, %v41_v4  ;;  %v46_v9 = vrot.slane %v37_v7, %v45_v5  ;;  %p129_p7 = por %p128_p6, %p127_p5 }
  0x30   :  { %v47_v11 = vcombine.low %v42_v8, %v46_v9  ;;  %p130_p8 = pnand %p129_p7, %p123_p4 }
  0x32   :  { %v54_v13 = vrot.slane %v47_v11, %v53_v10 }
  0x34   :  { %v56_v14 = vadd.f32 %v54_v13, %v36_v12 }
  0x36   :  { %57 = vst [vmem:[#allocation7] sm:$0xf] %v56_v14 }
  0x37   :  { %133 = shalt.err (!%p130_p8)
}
  0x38   :  { %s134_s11 = scalar_lea.hbm %s217_s2, 64 }
  0x39   :  { %p135_p9 = scmp.ne.s32.totalorder %s217_s2, %s134_s11  ;;  %p138_p10 = scmp.lt.u32.totalorder %s134_s11, %s217_s2 }
  0x3b   :  { %p140_p11 = pnand %p138_p10, %p135_p9 }
  0x3d   :  { %143 = shalt.err (!%p140_p11)
}
  0x3e   :  { %67 = dma.vmem_to_hbm [thread:$0]  %s65_s8, 64, %s217_s2, [#allocation4]  }
  0x3f   :  { %148 = dma.done.wait [#allocation4], 64  }
  0x40   :  { %149 = vsyncadd [#allocation4], 4294967232 }
  0x41   :  { %71 = vsyncpa [#allocation3], 1 }
  0x42   :  { %72 = vsyncpa [#allocation6], 1 }
  0x43   :  { %73 = vsyncpa [#allocation4], 1 }

</bundles_post_ra>
